<compile_context>
chip_gen: v7x
topology: tpu7x:2x2x1
jax: 0.10.0
libtpu: 0.0.40
codegen_flags: <defaults>
</compile_context>

<pallas_src>
import jax
import jax.numpy as jnp
from jax.experimental import pallas as pl
from jax.experimental.pallas import tpu as pltpu


def _identity_kernel(x_ref, o_ref):
    # Pure copy of the current VMEM tile (DMA-bound; nothing to overlap).
    o_ref[...] = x_ref[...]


# Tensors smaller than this bypass pallas_call (launch overhead dominates).
_MIN_KERNEL_BYTES = 1 << 20


def _block_budget_and_vmem_limit():
    """Per-generation block-byte budget and optional vmem_limit_bytes.

    4x block bytes (in + out, double-buffered) must stay under the scoped-VMEM
    limit: 16 MiB default on v5e, 32 MiB on v6e, 64 MiB physical on v7x.
    """
    kind = ""
    try:
        kind = jax.devices()[0].device_kind.lower()
    except Exception:  # pragma: no cover - defensive only
        pass
    if "7" in kind:  # TPU7x: 3.2 TB/s HBM, 64 MiB physical VMEM (raise limit)
        return 8 * 1024 * 1024, 48 << 20
    if "v6" in kind or "6e" in kind or "trillium" in kind:
        return 6 * 1024 * 1024, None  # 4x6 = 24 MiB < 32 MiB default limit
    # v5e and anything unknown: conservative, 4x3 = 12 MiB < 16 MiB default.
    return 3 * 1024 * 1024, None


def _round_rows(R, rows_budget, sub):
    """Pick tile_r: multiple of the dtype sublane multiple, prefer divisors of R."""
    tile_r = max(sub, (rows_budget // sub) * sub)
    if tile_r >= R:
        return R  # full-extent block is always a legal block shape
    if R % tile_r == 0:
        return tile_r
    # Prefer a divisor of R (avoids a ragged, partially-masked last writeback),
    # but never shrink the block by more than ~2x.
    cand = tile_r
    while cand >= sub:
        if R % cand == 0:
            if cand * 2 >= tile_r:
                return cand
            break
        cand -= sub
    return tile_r  # ragged last block; Pallas clamps it.


def identity(x):
    """Identity forward pass (preferred path).

    Returning the input removes 100% of the read+write HBM traffic; nothing
    inside a kernel can beat not launching one.
    """
    return x


def identity_pallas(x, *, force_kernel=False):
    """Identity as an explicit Pallas TPU copy kernel.

    This is a materialized copy (2x array bytes of HBM traffic). Use
    `identity()` unless a framework path really requires a pallas_call.
    `input_output_aliases={0: 0}` only reuses the output allocation when the
    operand buffer can be donated; it does NOT remove the DMA traffic.
    """
    orig_shape = x.shape
    orig_dtype = x.dtype
    n = x.size

    if n == 0:
        return x

    itemsize = jnp.dtype(orig_dtype).itemsize

    # Tiny tensors: fixed launch + single-step overhead dominates; a
    # sub-microsecond copy is cheaper through plain XLA / no-op return.
    if not force_kernel and n * itemsize < _MIN_KERNEL_BYTES:
        return x

    # --- choose a lane-dense 2D view (C is always a multiple of 128) -------
    lane = None
    for cand in (1024, 512, 256, 128):
        if n % cand == 0:
            lane = cand
            break

    padded_n = n
    if lane is not None:
        flat = x.reshape(n)
    else:
        # Pad the flat stream to a multiple of 1024 so stores stay full-width
        # `vst` (no masked vst.msk on a narrow last dim), slice back after.
        lane = 1024
        padded_n = ((n + lane - 1) // lane) * lane
        flat = jnp.pad(x.reshape(n), (0, padded_n - n))

    x2 = flat.reshape(padded_n // lane, lane)
    R, C = x2.shape  # C in {128, 256, 512, 1024} -> one row is <= 8 KiB.

    # --- block sizing by bytes ---------------------------------------------
    block_budget, vmem_limit = _block_budget_and_vmem_limit()
    # Native sublane multiple per dtype: 8 (f32), 16 (bf16), 32 (int8/fp8).
    sub = max(8, 32 // itemsize)
    rows_budget = max(1, block_budget // (C * itemsize))
    tile_r = _round_rows(R, rows_budget, sub)
    grid = (pl.cdiv(R, tile_r),)

    compiler_kwargs = dict(dimension_semantics=("parallel",))
    if vmem_limit is not None:
        compiler_kwargs["vmem_limit_bytes"] = vmem_limit

    # NOTE: in_specs and out_specs MUST use identical index maps so each step
    # writes exactly the rows it read; this is what makes the aliased
    # in-place copy safe under pipelined prefetch/writeback.
    out2 = pl.pallas_call(
        _identity_kernel,
        out_shape=jax.ShapeDtypeStruct((R, C), orig_dtype),
        grid_spec=pltpu.PrefetchScalarGridSpec(
            num_scalar_prefetch=0,
            grid=grid,
            in_specs=[pl.BlockSpec((tile_r, C), lambda i: (i, 0))],
            out_specs=pl.BlockSpec((tile_r, C), lambda i: (i, 0)),
        ),
        input_output_aliases={0: 0},
        compiler_params=pltpu.CompilerParams(**compiler_kwargs),
    )(x2)

    out_flat = out2.reshape(padded_n)
    if padded_n != n:
        out_flat = out_flat[:n]
    return out_flat.reshape(orig_shape)


if __name__ == "__main__":
    key = jax.random.PRNGKey(0)
    # Shapes consistent with a typical NCHW conv-net input.
    x = jax.random.normal(key, (2, 4, 16, 16), dtype=jnp.float32)

    # Preferred path: the no-op identity (matches nn.Identity semantics).
    y0 = jax.block_until_ready(identity(x))
    assert y0.shape == x.shape and y0.dtype == x.dtype
    assert bool(jnp.all(y0 == x))

    # Explicit Pallas kernel path (force_kernel so the small example still
    # exercises the pallas_call; jit so reshape + aliasing fuse cleanly).
    pallas_fn = jax.jit(lambda a: identity_pallas(a, force_kernel=True))
    y1 = jax.block_until_ready(pallas_fn(x))
    assert y1.shape == x.shape and y1.dtype == x.dtype
    assert bool(jnp.all(y1 == x))

    # Also exercise the padded (non-multiple-of-128) lane-dense path.
    x_odd = jax.random.normal(key, (3, 5, 7), dtype=jnp.float32)
    y2 = jax.block_until_ready(
        jax.jit(lambda a: identity_pallas(a, force_kernel=True))(x_odd))
    assert y2.shape == x_odd.shape and bool(jnp.all(y2 == x_odd))

    print("KERNEL_OK")
</pallas_src>

<mosaic_0001>
module attributes {stable_mosaic.version = 11 : i64} {
  func.func @_identity_kernel(%arg0: i32, %arg1: memref<2x1024xf32, #tpu.memory_space<vmem>>, %arg2: memref<2x1024xf32, #tpu.memory_space<vmem>>) attributes {dimension_semantics = [#tpu.dimension_semantics<parallel>], iteration_bounds = array<i64: 1>, scalar_prefetch = 0 : i64, scratch_operands = 0 : i64, tpu.core_type = #tpu.core_type<tc>, window_params = [{transform_indices = @transform_0, window_bounds = array<i64: 2, 1024>}, {transform_indices = @transform_1, window_bounds = array<i64: 2, 1024>}]} {
    %c0 = arith.constant 0 : index
    %c0_0 = arith.constant 0 : index
    %0 = vector.load %arg1[%c0, %c0_0] : memref<2x1024xf32, #tpu.memory_space<vmem>>, vector<2x1024xf32>
    %c0_1 = arith.constant 0 : index
    %c0_2 = arith.constant 0 : index
    %1 = vector.load %arg2[%c0_1, %c0_2] : memref<2x1024xf32, #tpu.memory_space<vmem>>, vector<2x1024xf32>
    tpu.vector_store %arg2[%c0_1, %c0_2], %0 {strides = array<i32>} : memref<2x1024xf32, #tpu.memory_space<vmem>>, vector<2x1024xf32>,
    return
  }
  func.func @transform_0(%arg0: i32) -> (i32, i32) {
    %c0_i32 = arith.constant 0 : i32
    %c0_i32_0 = arith.constant 0 : i32
    return %arg0, %c0_i32 : i32, i32
  }
  func.func @transform_1(%arg0: i32) -> (i32, i32) {
    %c0_i32 = arith.constant 0 : i32
    %c0_i32_0 = arith.constant 0 : i32
    return %arg0, %c0_i32 : i32, i32
  }
}

</mosaic_0001>

<bundles_post_ra>
// kernel: _lambda_.1
= control target key start
LH: loop header
LB: loop body
LE: loop exit
PB: predicated region body
PF: predicated region fallthrough
CT: control target
= control target key end

     0   :  { %s38_s0 = inlined_call_operand.vmem [shape: f32[2,1024], index: 0, kind: input, shape index: {}, may-alias: {0,1}]   ;;  %s39_s1 = inlined_call_operand.vmem [shape: f32[2,1024], index: 1, kind: output, shape index: {}, may-alias: {0,1}]  }
   0x1   :  { %v8_v0 = vld [vmem:[%s38_s0] sm:$0xff]  ;;  %v9_v1 = vld [vmem:[%s38_s0 + $0x8] sm:$0xff] }
   0x2   :  { %10 = vst [vmem:[%s39_s1] sm:$0xff] %v8_v0  ;;  %11 = vst [vmem:[%s39_s1 + $0x8] sm:$0xff] %v9_v1 }

</bundles_post_ra>
